<compile_context>
chip_gen: v7x
topology: tpu7x:2x2x1
jax: 0.10.0
libtpu: 0.0.40
codegen_flags: <defaults>
</compile_context>

<pallas_src>
import functools

import jax
import jax.numpy as jnp
from jax.experimental import pallas as pl
from jax.experimental.pallas import tpu as pltpu

MIN_VAL = 1e-08
HIDDEN_DIM = 64


def _softplus(z):
    # Branch-free, numerically stable softplus.
    return jnp.maximum(z, 0.0) + jnp.log1p(jnp.exp(-jnp.abs(z)))


def policy_kernel(x_ref, w1_ref, b1_ref, w2_ref, b2_ref, wh_ref, bh_ref,
                  out_ref, *, action_dim):
    # fc1 + ReLU (bf16 MXU operands, f32 accumulation, f32 elementwise epilogue).
    h1 = jnp.dot(x_ref[...], w1_ref[...], preferred_element_type=jnp.float32)
    h1 = jnp.maximum(h1 + b1_ref[...], 0.0)

    # fc2 + ReLU.
    h2 = jnp.dot(h1.astype(w2_ref.dtype), w2_ref[...],
                 preferred_element_type=jnp.float32)
    h2 = jnp.maximum(h2 + b2_ref[...], 0.0)

    # Fused heads: one (hidden, head_pad) matmul covering fc_mu and fc_std
    # (extra padding columns carry zero weights / bias and are discarded by the wrapper).
    heads = jnp.dot(h2.astype(wh_ref.dtype), wh_ref[...],
                    preferred_element_type=jnp.float32) + bh_ref[...]

    # First A lanes -> tanh (mu); remaining lanes -> softplus + min_val (std / padding).
    lane = jax.lax.broadcasted_iota(jnp.int32, heads.shape, dimension=1)
    mu_all = jnp.tanh(heads)
    std_all = _softplus(heads) + MIN_VAL
    out_ref[...] = jnp.where(lane < action_dim, mu_all, std_all)


def policy_forward(x, params, *, tile_b=512, use_bf16=True):
    """Runs the fused PolicyNetwork forward. Returns (mu, std), both (B, action_dim) f32."""
    B, state_dim = x.shape
    hidden = params["w1"].shape[1]
    A = params["wmu"].shape[1]

    # Fuse the two heads into a single (hidden, head_pad) matmul, padded so the kernel's
    # output slab is a multiple of 128 lanes (unmasked stores).
    head_pad = max(128, ((2 * A + 127) // 128) * 128)
    w_heads = jnp.concatenate([params["wmu"], params["wstd"]], axis=1)
    b_heads = jnp.concatenate([params["bmu"], params["bstd"]], axis=1)
    w_heads = jnp.pad(w_heads, ((0, 0), (0, head_pad - 2 * A)))
    b_heads = jnp.pad(b_heads, ((0, 0), (0, head_pad - 2 * A)))

    mx_dtype = jnp.bfloat16 if use_bf16 else jnp.float32
    xq = x.astype(mx_dtype)
    w1 = params["w1"].astype(mx_dtype)
    w2 = params["w2"].astype(mx_dtype)
    wh = w_heads.astype(mx_dtype)
    b1 = params["b1"].astype(jnp.float32)
    b2 = params["b2"].astype(jnp.float32)
    bh = b_heads.astype(jnp.float32)

    # Batch tile: multiple of 8 (sublane), capped at tile_b; pad batch to a tile multiple.
    if B >= tile_b:
        tb = tile_b
    else:
        tb = max(8, ((B + 7) // 8) * 8)
    b_padded = ((B + tb - 1) // tb) * tb
    if b_padded != B:
        xq = jnp.pad(xq, ((0, b_padded - B), (0, 0)))
    grid = (b_padded // tb,)

    out = pl.pallas_call(
        functools.partial(policy_kernel, action_dim=A),
        out_shape=jax.ShapeDtypeStruct((b_padded, head_pad), jnp.float32),
        grid_spec=pltpu.PrefetchScalarGridSpec(
            num_scalar_prefetch=0,
            grid=grid,
            in_specs=[
                pl.BlockSpec((tb, state_dim), lambda i: (i, 0)),       # x tile
                pl.BlockSpec((state_dim, hidden), lambda i: (0, 0)),   # W1 (resident)
                pl.BlockSpec((1, hidden), lambda i: (0, 0)),           # b1
                pl.BlockSpec((hidden, hidden), lambda i: (0, 0)),      # W2
                pl.BlockSpec((1, hidden), lambda i: (0, 0)),           # b2
                pl.BlockSpec((hidden, head_pad), lambda i: (0, 0)),    # fused heads W
                pl.BlockSpec((1, head_pad), lambda i: (0, 0)),         # fused heads b
            ],
            out_specs=pl.BlockSpec((tb, head_pad), lambda i: (i, 0)),  # fused (mu|std|pad)
        ),
        compiler_params=pltpu.CompilerParams(
            dimension_semantics=("parallel",),  # batch rows independent -> megacore split
        ),
    )(xq, w1, b1, w2, b2, wh, bh)

    mu = out[:B, :A]
    std = out[:B, A:2 * A]
    return mu, std


def init_params(key, state_dim, action_dim, hidden_dim=HIDDEN_DIM):
    """Deterministic init mirroring reset_parameters (uniform +/- 1/sqrt(fan_in))."""
    ks = jax.random.split(key, 8)

    def lin(kw, kb, fan_in, fan_out):
        lim = 1.0 / jnp.sqrt(jnp.float32(fan_in))
        w = jax.random.uniform(kw, (fan_in, fan_out), jnp.float32, -lim, lim)
        b = jax.random.uniform(kb, (1, fan_out), jnp.float32, -lim, lim)
        return w, b

    w1, b1 = lin(ks[0], ks[1], state_dim, hidden_dim)
    w2, b2 = lin(ks[2], ks[3], hidden_dim, hidden_dim)
    wmu, bmu = lin(ks[4], ks[5], hidden_dim, action_dim)
    wstd, bstd = lin(ks[6], ks[7], hidden_dim, action_dim)
    return dict(w1=w1, b1=b1, w2=w2, b2=b2,
                wmu=wmu, bmu=bmu, wstd=wstd, bstd=bstd)


if __name__ == "__main__":
    key = jax.random.PRNGKey(0)
    k_x, k_p = jax.random.split(key)

    batch, state_dim, action_dim = 2, 32, 4
    x = jax.random.normal(k_x, (batch, state_dim), jnp.float32)
    params = init_params(k_p, state_dim, action_dim)

    mu, std = policy_forward(x, params)
    jax.block_until_ready((mu, std))

    # Pure-JAX reference mirroring the kernel's bf16-operand / f32-accumulate path.
    mx = jnp.bfloat16
    w_heads = jnp.concatenate([params["wmu"], params["wstd"]], axis=1).astype(mx)
    b_heads = jnp.concatenate([params["bmu"], params["bstd"]], axis=1)
    h1 = jnp.maximum(jnp.dot(x.astype(mx), params["w1"].astype(mx),
                             preferred_element_type=jnp.float32) + params["b1"], 0.0)
    h2 = jnp.maximum(jnp.dot(h1.astype(mx), params["w2"].astype(mx),
                             preferred_element_type=jnp.float32) + params["b2"], 0.0)
    heads = jnp.dot(h2.astype(mx), w_heads,
                    preferred_element_type=jnp.float32) + b_heads
    mu_ref = jnp.tanh(heads[:, :action_dim])
    std_ref = jax.nn.softplus(heads[:, action_dim:]) + MIN_VAL

    assert mu.shape == (batch, action_dim) and std.shape == (batch, action_dim)
    assert jnp.allclose(mu, mu_ref, atol=1e-4, rtol=1e-4), "mu mismatch"
    assert jnp.allclose(std, std_ref, atol=1e-4, rtol=1e-4), "std mismatch"

    print("KERNEL_OK")
</pallas_src>

<mosaic_0001>
module attributes {stable_mosaic.version = 11 : i64} {
  func.func @policy_kernel(%arg0: i32, %arg1: memref<8x32xbf16, #tpu.memory_space<vmem>>, %arg2: memref<32x64xbf16, #tpu.memory_space<vmem>>, %arg3: memref<1x64xf32, #tpu.memory_space<vmem>>, %arg4: memref<64x64xbf16, #tpu.memory_space<vmem>>, %arg5: memref<1x64xf32, #tpu.memory_space<vmem>>, %arg6: memref<64x128xbf16, #tpu.memory_space<vmem>>, %arg7: memref<1x128xf32, #tpu.memory_space<vmem>>, %arg8: memref<8x128xf32, #tpu.memory_space<vmem>>) attributes {dimension_semantics = [#tpu.dimension_semantics<parallel>], iteration_bounds = array<i64: 1>, scalar_prefetch = 0 : i64, scratch_operands = 0 : i64, tpu.core_type = #tpu.core_type<tc>, window_params = [{transform_indices = @transform_0, window_bounds = array<i64: 8, 32>}, {pipeline_mode = #tpu.pipeline_mode<synchronous>, transform_indices = @transform_1, window_bounds = array<i64: 32, 64>}, {pipeline_mode = #tpu.pipeline_mode<synchronous>, transform_indices = @transform_2, window_bounds = array<i64: 1, 64>}, {pipeline_mode = #tpu.pipeline_mode<synchronous>, transform_indices = @transform_3, window_bounds = array<i64: 64, 64>}, {pipeline_mode = #tpu.pipeline_mode<synchronous>, transform_indices = @transform_4, window_bounds = array<i64: 1, 64>}, {pipeline_mode = #tpu.pipeline_mode<synchronous>, transform_indices = @transform_5, window_bounds = array<i64: 64, 128>}, {pipeline_mode = #tpu.pipeline_mode<synchronous>, transform_indices = @transform_6, window_bounds = array<i64: 1, 128>}, {transform_indices = @transform_7, window_bounds = array<i64: 8, 128>}]} {
    %c0 = arith.constant 0 : index
    %c0_0 = arith.constant 0 : index
    %0 = vector.load %arg1[%c0, %c0_0] : memref<8x32xbf16, #tpu.memory_space<vmem>>, vector<8x32xbf16>
    %c0_1 = arith.constant 0 : index
    %c0_2 = arith.constant 0 : index
    %1 = vector.load %arg2[%c0_1, %c0_2] : memref<32x64xbf16, #tpu.memory_space<vmem>>, vector<32x64xbf16>
    %cst = arith.constant dense<0.000000e+00> : vector<8x64xf32>
    %2 = tpu.matmul %0, %1, %cst {dimension_numbers = #tpu.dot_dimension_numbers<[1], [0], [0], [1], [0, 0, 1, 1], [], []>} : vector<8x32xbf16>, vector<32x64xbf16>, vector<8x64xf32> -> vector<8x64xf32>
    %c0_3 = arith.constant 0 : index
    %c0_4 = arith.constant 0 : index
    %3 = vector.load %arg3[%c0_3, %c0_4] : memref<1x64xf32, #tpu.memory_space<vmem>>, vector<1x64xf32>
    %4 = vector.broadcast %3 : vector<1x64xf32> to vector<8x64xf32>
    %5 = arith.addf %2, %4 : vector<8x64xf32>
    %cst_5 = arith.constant 0.000000e+00 : f32
    %6 = vector.broadcast %cst_5 : f32 to vector<8x64xf32>
    %7 = arith.maximumf %5, %6 : vector<8x64xf32>
    %8 = arith.truncf %7 : vector<8x64xf32> to vector<8x64xbf16>
    %c0_6 = arith.constant 0 : index
    %c0_7 = arith.constant 0 : index
    %9 = vector.load %arg4[%c0_6, %c0_7] : memref<64x64xbf16, #tpu.memory_space<vmem>>, vector<64x64xbf16>
    %cst_8 = arith.constant dense<0.000000e+00> : vector<8x64xf32>
    %10 = tpu.matmul %8, %9, %cst_8 {dimension_numbers = #tpu.dot_dimension_numbers<[1], [0], [0], [1], [0, 0, 1, 1], [], []>} : vector<8x64xbf16>, vector<64x64xbf16>, vector<8x64xf32> -> vector<8x64xf32>
    %c0_9 = arith.constant 0 : index
    %c0_10 = arith.constant 0 : index
    %11 = vector.load %arg5[%c0_9, %c0_10] : memref<1x64xf32, #tpu.memory_space<vmem>>, vector<1x64xf32>
    %12 = vector.broadcast %11 : vector<1x64xf32> to vector<8x64xf32>
    %13 = arith.addf %10, %12 : vector<8x64xf32>
    %cst_11 = arith.constant 0.000000e+00 : f32
    %14 = vector.broadcast %cst_11 : f32 to vector<8x64xf32>
    %15 = arith.maximumf %13, %14 : vector<8x64xf32>
    %16 = arith.truncf %15 : vector<8x64xf32> to vector<8x64xbf16>
    %c0_12 = arith.constant 0 : index
    %c0_13 = arith.constant 0 : index
    %17 = vector.load %arg6[%c0_12, %c0_13] : memref<64x128xbf16, #tpu.memory_space<vmem>>, vector<64x128xbf16>
    %cst_14 = arith.constant dense<0.000000e+00> : vector<8x128xf32>
    %18 = tpu.matmul %16, %17, %cst_14 {dimension_numbers = #tpu.dot_dimension_numbers<[1], [0], [0], [1], [0, 0, 1, 1], [], []>} : vector<8x64xbf16>, vector<64x128xbf16>, vector<8x128xf32> -> vector<8x128xf32>
    %c0_15 = arith.constant 0 : index
    %c0_16 = arith.constant 0 : index
    %19 = vector.load %arg7[%c0_15, %c0_16] : memref<1x128xf32, #tpu.memory_space<vmem>>, vector<1x128xf32>
    %20 = vector.broadcast %19 : vector<1x128xf32> to vector<8x128xf32>
    %21 = arith.addf %18, %20 : vector<8x128xf32>
    %22 = tpu.iota {dimensions = array<i32: 1>} : vector<8x128xi32>
    %23 = math.tanh %21 : vector<8x128xf32>
    %cst_17 = arith.constant 0.000000e+00 : f32
    %24 = vector.broadcast %cst_17 : f32 to vector<8x128xf32>
    %25 = arith.maximumf %21, %24 : vector<8x128xf32>
    %26 = math.absf %21 : vector<8x128xf32>
    %cst_18 = arith.constant 0.000000e+00 : f32
    %27 = vector.broadcast %cst_18 : f32 to vector<8x128xf32>
    %28 = arith.subf %27, %26 : vector<8x128xf32>
    %29 = math.exp %28 : vector<8x128xf32>
    %30 = math.log1p %29 : vector<8x128xf32>
    %31 = arith.addf %25, %30 : vector<8x128xf32>
    %cst_19 = arith.constant 9.99999993E-9 : f32
    %32 = vector.broadcast %cst_19 : f32 to vector<8x128xf32>
    %33 = arith.addf %31, %32 : vector<8x128xf32>
    %c4_i32 = arith.constant 4 : i32
    %34 = vector.broadcast %c4_i32 : i32 to vector<8x128xi32>
    %35 = arith.cmpi slt, %22, %34 : vector<8x128xi32>
    %36 = arith.select %35, %23, %33 : vector<8x128xi1>, vector<8x128xf32>
    %c0_20 = arith.constant 0 : index
    %c0_21 = arith.constant 0 : index
    %37 = vector.load %arg8[%c0_20, %c0_21] : memref<8x128xf32, #tpu.memory_space<vmem>>, vector<8x128xf32>
    tpu.vector_store %arg8[%c0_20, %c0_21], %36 {strides = array<i32>} : memref<8x128xf32, #tpu.memory_space<vmem>>, vector<8x128xf32>,
    return
  }
  func.func @transform_0(%arg0: i32) -> (i32, i32) {
    %c0_i32 = arith.constant 0 : i32
    %c0_i32_0 = arith.constant 0 : i32
    return %arg0, %c0_i32 : i32, i32
  }
  func.func @transform_1(%arg0: i32) -> (i32, i32) {
    %c0_i32 = arith.constant 0 : i32
    %c0_i32_0 = arith.constant 0 : i32
    %c0_i32_1 = arith.constant 0 : i32
    return %c0_i32, %c0_i32_0 : i32, i32
  }
  func.func @transform_2(%arg0: i32) -> (i32, i32) {
    %c0_i32 = arith.constant 0 : i32
    %c0_i32_0 = arith.constant 0 : i32
    %c0_i32_1 = arith.constant 0 : i32
    return %c0_i32, %c0_i32_0 : i32, i32
  }
  func.func @transform_3(%arg0: i32) -> (i32, i32) {
    %c0_i32 = arith.constant 0 : i32
    %c0_i32_0 = arith.constant 0 : i32
    %c0_i32_1 = arith.constant 0 : i32
    return %c0_i32, %c0_i32_0 : i32, i32
  }
  func.func @transform_4(%arg0: i32) -> (i32, i32) {
    %c0_i32 = arith.constant 0 : i32
    %c0_i32_0 = arith.constant 0 : i32
    %c0_i32_1 = arith.constant 0 : i32
    return %c0_i32, %c0_i32_0 : i32, i32
  }
  func.func @transform_5(%arg0: i32) -> (i32, i32) {
    %c0_i32 = arith.constant 0 : i32
    %c0_i32_0 = arith.constant 0 : i32
    %c0_i32_1 = arith.constant 0 : i32
    return %c0_i32, %c0_i32_0 : i32, i32
  }
  func.func @transform_6(%arg0: i32) -> (i32, i32) {
    %c0_i32 = arith.constant 0 : i32
    %c0_i32_0 = arith.constant 0 : i32
    %c0_i32_1 = arith.constant 0 : i32
    return %c0_i32, %c0_i32_0 : i32, i32
  }
  func.func @transform_7(%arg0: i32) -> (i32, i32) {
    %c0_i32 = arith.constant 0 : i32
    %c0_i32_0 = arith.constant 0 : i32
    return %arg0, %c0_i32 : i32, i32
  }
}

</mosaic_0001>

<bundles_post_ra>
// kernel: tpu_custom_call.1
= control target key start
LH: loop header
LB: loop body
LE: loop exit
PB: predicated region body
PF: predicated region fallthrough
CT: control target
= control target key end

     0   :  { %12 = vsyncpa [#allocation3], 0  ;;  %s693_s0 = inlined_call_operand.hbm [shape: bf16[8,32], index: 0, kind: input, shape index: {}]   ;;  %s694_s1 = inlined_call_operand.hbm [shape: bf16[32,64], index: 1, kind: input, shape index: {}]   ;;  %s695_s2 = inlined_call_operand.vmem [shape: f32[1,64], index: 2, kind: input, shape index: {}]   ;;  %s696_s3 = inlined_call_operand.hbm [shape: bf16[64,64], index: 3, kind: input, shape index: {}]   ;;  %s697_s4 = inlined_call_operand.vmem [shape: f32[1,64], index: 4, kind: input, shape index: {}]   ;;  %s698_s5 = inlined_call_operand.hbm [shape: bf16[64,128], index: 5, kind: input, shape index: {}]   ;;  %s699_s6 = inlined_call_operand.vmem [shape: f32[1,128], index: 6, kind: input, shape index: {}]   ;;  %s700_s7 = inlined_call_operand.hbm [shape: f32[8,128], index: 7, kind: output, shape index: {}]  }
   0x1   :  { %13 = vsyncpa [#allocation6], 0 }
   0x2   :  { %14 = vsyncpa [#allocation9], 0 }
   0x3   :  { %15 = vsyncpa [#allocation4], 0  ;;  %s561_s24 = smov [#allocation5]   ;;  %s443_s28 = scalar_lea.hbm %s694_s1, 256 }
   0x4   :  { %s31_s25 = sshll.u32 %s561_s24, 4  ;;  %p444_p0 = scmp.ne.s32.totalorder %s694_s1, %s443_s28  ;;  %s32_s25 = int_to_ptr.vmem [resolvable:$true] %s31_s25 }
   0x5   :  { %p447_p1 = scmp.lt.u32.totalorder %s443_s28, %s694_s1 }
   0x7   :  { %p449_p2 = pnand %p447_p1, %p444_p0 }
   0x9   :  { %452 = shalt.err (!%p449_p2)
}
   0xa   :  { %s453_s10 = scalar_lea.vmem %s32_s25, 256  ;;  %p458_p4 = scmp.lt.s32.totalorder %s32_s25, %s32_s25 }
   0xb   :  { %p454_p3 = scmp.ne.s32.totalorder %s32_s25, %s453_s10  ;;  %p459_p5 = scmp.lt.s32.totalorder %s453_s10, %s453_s10 }
   0xd   :  { %p460_p6 = por %p459_p5, %p458_p4 }
   0xf   :  { %p461_p7 = pnand %p460_p6, %p454_p3 }
  0x11   :  { %464 = shalt.err (!%p461_p7)
}
  0x12   :  { %s562_s11 = smov 64   ;;  %s563_s12 = smov 4  }
  0x13   :  { %37 = dma.hbm_to_vmem [thread:$0]  %s694_s1, 256, %s32_s25, [#allocation6], %s562_s11, %s562_s11, %s563_s12  }
  0x14   :  { %s564_s15 = smov [#allocation2]   ;;  %s565_s17 = smov [#allocation7]  }
  0x15   :  { %s22_s16 = sshll.u32 %s564_s15, 4  ;;  %s45_s18 = sshll.u32 %s565_s17, 4  ;;  %s23_s16 = int_to_ptr.vmem [resolvable:$true] %s22_s16  ;;  %s46_s18 = int_to_ptr.vmem [resolvable:$true] %s45_s18 }
  0x16   :  { %s465_s21 = scalar_lea.hbm %s693_s0, 64 }
  0x17   :  { %p466_p8 = scmp.ne.s32.totalorder %s693_s0, %s465_s21  ;;  %p469_p9 = scmp.lt.u32.totalorder %s465_s21, %s693_s0 }
  0x19   :  { %p471_p10 = pnand %p469_p9, %p466_p8 }
  0x1b   :  { %474 = shalt.err (!%p471_p10)
}
  0x1c   :  { %s475_s1 = scalar_lea.vmem %s23_s16, 64  ;;  %p480_p12 = scmp.lt.s32.totalorder %s23_s16, %s23_s16 }
  0x1d   :  { %p476_p11 = scmp.ne.s32.totalorder %s23_s16, %s475_s1  ;;  %p481_p13 = scmp.lt.s32.totalorder %s475_s1, %s475_s1 }
  0x1f   :  { %p482_p0 = por %p481_p13, %p480_p12 }
  0x21   :  { %p483_p1 = pnand %p482_p0, %p476_p11 }
  0x23   :  { %486 = shalt.err (!%p483_p1)
}
  0x24   :  { %25 = dma.hbm_to_vmem [thread:$0]  %s693_s0, 64, %s23_s16, [#allocation3]  }
  0x25   :  { %s487_s30 = scalar_lea.hbm %s696_s3, 512 }
  0x26   :  { %p488_p2 = scmp.ne.s32.totalorder %s696_s3, %s487_s30  ;;  %p491_p3 = scmp.lt.u32.totalorder %s487_s30, %s696_s3 }
  0x28   :  { %p493_p4 = pnand %p491_p3, %p488_p2 }
  0x2a   :  { %496 = shalt.err (!%p493_p4)
}
  0x2b   :  { %s497_s14 = scalar_lea.vmem %s46_s18, 512  ;;  %p502_p6 = scmp.lt.s32.totalorder %s46_s18, %s46_s18 }
  0x2c   :  { %p498_p5 = scmp.ne.s32.totalorder %s46_s18, %s497_s14  ;;  %p503_p7 = scmp.lt.s32.totalorder %s497_s14, %s497_s14 }
  0x2e   :  { %p504_p8 = por %p503_p7, %p502_p6 }
  0x30   :  { %p505_p9 = pnand %p504_p8, %p498_p5 }
  0x32   :  { %508 = shalt.err (!%p505_p9)
}
  0x33   :  { %51 = dma.hbm_to_vmem [thread:$0]  %s696_s3, 512, %s46_s18, [#allocation6], %s562_s11, %s562_s11, %s563_s12  }
  0x34   :  { %s566_s16 = smov [#allocation8]   ;;  %s509_s21 = scalar_lea.hbm %s698_s5, 512 }
  0x35   :  { %s59_s17 = sshll.u32 %s566_s16, 4  ;;  %p510_p10 = scmp.ne.s32.totalorder %s698_s5, %s509_s21  ;;  %s60_s17 = int_to_ptr.vmem [resolvable:$true] %s59_s17 }
  0x36   :  { %p513_p11 = scmp.lt.u32.totalorder %s509_s21, %s698_s5 }
  0x38   :  { %p515_p12 = pnand %p513_p11, %p510_p10 }
  0x3a   :  { %518 = shalt.err (!%p515_p12)
}
  0x3b   :  { %s519_s1 = scalar_lea.vmem %s60_s17, 512  ;;  %p524_p0 = scmp.lt.s32.totalorder %s60_s17, %s60_s17 }
  0x3c   :  { %p520_p13 = scmp.ne.s32.totalorder %s60_s17, %s519_s1  ;;  %p525_p1 = scmp.lt.s32.totalorder %s519_s1, %s519_s1 }
  0x3e   :  { %p526_p2 = por %p525_p1, %p524_p0 }
  0x40   :  { %p527_p3 = pnand %p526_p2, %p520_p13 }
  0x42   :  { %530 = shalt.err (!%p527_p3)
}
  0x43   :  { %65 = dma.hbm_to_vmem [thread:$0]  %s698_s5, 512, %s60_s17, [#allocation9], %s562_s11, %s562_s11, %s563_s12  }
  0x44   :  { %553 = dma.done.wait [#allocation3], 64  }
  0x45   :  { %554 = vsyncadd [#allocation3], 4294967232 }
  0x46   :  { %555 = dma.done.wait [#allocation6], 768  }
  0x47   :  { %556 = vsyncadd [#allocation6], 4294966528 }
  0x48   :  { %557 = dma.done.wait [#allocation9], 512  }
  0x49   :  { %558 = vsyncadd [#allocation9], 4294966784  ;;  %v567_v0 = vmov 0.0   ;;  %vm568_vm0 = vmmov 0   ;;  %v427_v1 = vld [vmem:[#allocation5] sm:$0xff]   ;;  %v428_v2 = vld [vmem:[#allocation5 + $0x8] sm:$0xff]   ;;  %v318_v41 = vlaneseq }
  0x4a   :  { %386 = vmatprep.subr.bf16.mxu0 %v567_v0  ;;  %390 = vmatprep.mubr.msk.bf16.mxu0 %vm568_vm0, %v567_v0  ;;  %v429_v3 = vld [vmem:[#allocation7] sm:$0xff]   ;;  %v81_v4 = vld [vmem:[#allocation2] sm:$0xf]  ;;  %vm105_vm1 = vcmask 261120   ;;  %v431_v6 = vld [vmem:[#allocation7 + $0x10] sm:$0xff]   ;;  %vm190_vm2 = vcmask 523264  }
  0x4b   :  { %394 = vmatprep.subr.bf16.mxu1 %v567_v0  ;;  %402 = vmatprep.mubr.msk.bf16.mxu1 %vm568_vm0, %v567_v0  ;;  %v430_v5 = vld [vmem:[#allocation7 + $0x8] sm:$0xff]   ;;  %v432_v7 = vld [vmem:[#allocation7 + $0x18] sm:$0xff]   ;;  %v433_v8 = vld [vmem:[#allocation8] sm:$0xff]   ;;  %v319_v46 = vand.u32 127, %v318_v41 }
  0x4c   :  { %387 = vmatpush3.bf16.msra.mxu0 %v427_v1  ;;  %395 = vmatpush3.bf16.msra.mxu1 %v429_v3  ;;  %v434_v9 = vld [vmem:[#allocation8 + $0x8] sm:$0xff]   ;;  %v435_v18 = vld [vmem:[#allocation8 + $0x10] sm:$0xff]   ;;  %v436_v19 = vld [vmem:[#allocation8 + $0x18] sm:$0xff]  }
  0x4d   :  { %388 = vmatprep.subr.bf16.mxu0 %v567_v0  ;;  %396 = vmatprep.subr.bf16.mxu1 %v567_v0  ;;  %v357_v10 = vld [vmem:[%s695_s2] ss:$0 sm:$0xff]  ;;  %vm337_vm4 = vcmp.lt.s32.totalorder %v319_v46, 4 }
  0x4e   :  { %v361_v20 = vld [vmem:[%s697_s4] ss:$0 sm:$0xff]  ;;  %s569_s4 = smov [#allocation10]  }
  0x4f   :  { %v367_v28 = vld [vmem:[%s699_s6] ss:$0 sm:$0xff]  ;;  %s346_s6 = sshll.u32 %s569_s4, 4  ;;  %s347_s6 = int_to_ptr.vmem [resolvable:$true] %s346_s6 }
  0x50   :  { %389 = vmatpush3.bf16.msra.mxu0 %v428_v2  ;;  %397 = vmatpush3.bf16.msra.mxu1 %v430_v5  ;;  %s531_s28 = scalar_lea.vmem %s347_s6, 128  ;;  %p536_p5 = scmp.lt.s32.totalorder %s347_s6, %s347_s6 }
  0x51   :  { %406 = vmatprep.subr.bf16.mxu0 %v567_v0  ;;  %398 = vmatprep.subr.bf16.mxu1 %v567_v0  ;;  %p532_p4 = scmp.ne.s32.totalorder %s347_s6, %s531_s28  ;;  %p537_p6 = scmp.lt.s32.totalorder %s531_s28, %s531_s28 }
  0x53   :  { %391 = vmatmul.mubr.msk.bf16.vlgmr.msra.gmra.mrb[0].mxu0 %vm105_vm1, %v81_v4  ;;  %p538_p7 = por %p537_p6, %p536_p5 }
  0x54   :  { %414 = vmatprep.mubr.msk.bf16.mxu0 %vm568_vm0, %v567_v0  ;;  %399 = vmatpush3.bf16.msra.mxu1 %v431_v6 }
  0x55   :  { %400 = vmatprep.subr.bf16.mxu1 %v567_v0  ;;  %407 = vmatpush3.bf16.msra.mxu0 %v433_v8  ;;  %p539_p8 = pnand %p538_p7, %p532_p4 }
  0x56   :  { %408 = vmatprep.subr.bf16.mxu0 %v567_v0 }
  0x58   :  { %401 = vmatpush3.bf16.msra.mxu1 %v432_v7 }
  0x59   :  { %409 = vmatpush3.bf16.msra.mxu0 %v434_v9 }
  0x5a   :  { %410 = vmatprep.subr.bf16.mxu0 %v567_v0 }
  0x5d   :  { %411 = vmatpush3.bf16.msra.mxu0 %v435_v18 }
  0x5e   :  { %412 = vmatprep.subr.bf16.mxu0 %v567_v0 }
  0x61   :  { %413 = vmatpush3.bf16.msra.mxu0 %v436_v19 }
 0x126   :  { %v143_v11 = vpop.f32.mrb[0].mxu0 }
 0x127   :  { %v144_v12 = vadd.f32 %v357_v10, %v143_v11  ;;  %v392_v13 = vpop.f32.mrb[1].mxu0 }
 0x128   :  { %v146_v14 = vpop.f32.mrb[2].mxu0 }
 0x129   :  { %v149_v15 = vmax.f32 %v144_v12, 0.0  ;;  %v393_v16 = vpop.f32.mrb[3].mxu0 }
 0x12b   :  { %v150_v17 = vpack.c.bf16 %v149_v15, %v149_v15 }
 0x12d   :  { %403 = vmatmul.mubr.msk.bf16.vlgmr.msra.gmra.mrb[0].mxu1 %vm190_vm2, %v150_v17 }
 0x200   :  { %v228_v21 = vpop.f32.mrb[0].mxu1 }
 0x201   :  { %v229_v22 = vadd.f32 %v361_v20, %v228_v21  ;;  %v404_v23 = vpop.f32.mrb[1].mxu1 }
 0x202   :  { %v231_v24 = vpop.f32.mrb[2].mxu1 }
 0x203   :  { %v234_v25 = vmax.f32 %v229_v22, 0.0  ;;  %v405_v26 = vpop.f32.mrb[3].mxu1 }
 0x205   :  { %v235_v27 = vpack.c.bf16 %v234_v25, %v234_v25 }
 0x207   :  { %415 = vmatmul.mubr.msk.bf16.vlgmr.msra.gmra.mrb[4].mxu0 %vm190_vm2, %v235_v27 }
 0x2da   :  { %v312_v29 = vpop.f32.mrb[4].mxu0 }
 0x2db   :  { %v313_v30 = vadd.f32 %v367_v28, %v312_v29  ;;  %v416_v31 = vpop.f32.mrb[5].mxu0 }
 0x2dc   :  { %v315_v32 = vpop.f32.mrb[6].mxu0 }
 0x2dd   :  { %v322_v33 = vand.u32 2147483647, %v313_v30  ;;  %v417_v34 = vpop.f32.mrb[7].mxu0  ;;  %v321_v47 = vmax.f32 %v313_v30, 0.0 }
 0x2df   :  { %v323_v35 = vsub.f32 0.0, %v322_v33 }
 0x2e1   :  { %v324_v36 = vmul.f32 1.442695, %v323_v35 }
 0x2e3   :  { %437 = vpow2.f32 %v324_v36 }
 0x2ed   :  { %v438_v37 = vpop.eup %437 }
 0x2ee   :  { %v326_v38 = vadd.f32 1.0, %v438_v37  ;;  %v329_v39 = vmul.f32 -0.5, %v438_v37  ;;  %v332_v42 = vand.u32 2147483647, %v438_v37 }
 0x2f0   :  { %439 = vlog2.f32 %v326_v38  ;;  %v330_v40 = vadd.f32 1.0, %v329_v39  ;;  %vm333_vm3 = vcmp.lt.f32.partialorder %v332_v42, 0.0004427343 }
 0x2f1   :  { %441 = vtanh.f32 %v313_v30 }
 0x2f2   :  { %v331_v45 = vmul.f32 %v438_v37, %v330_v40 }
 0x2fa   :  { %v440_v43 = vpop.eup %439 }
 0x2fb   :  { %v328_v44 = vmul.f32 0.6931472, %v440_v43  ;;  %v442_v51 = vpop.eup %441 }
 0x2fd   :  { %v334_v48 = vsel %vm333_vm3, %v331_v45, %v328_v44 }
 0x2fe   :  { %v335_v49 = vadd.f32 %v334_v48, %v321_v47 }
 0x300   :  { %v336_v50 = vadd.f32 1e-08, %v335_v49 }
 0x302   :  { %v338_v52 = vsel %vm337_vm4, %v442_v51, %v336_v50 }
 0x303   :  { %339 = vst [vmem:[#allocation10] sm:$0xff] %v338_v52 }
 0x304   :  { %542 = shalt.err (!%p539_p8)
}
 0x305   :  { %s543_s8 = scalar_lea.hbm %s700_s7, 128 }
 0x306   :  { %p544_p9 = scmp.ne.s32.totalorder %s700_s7, %s543_s8  ;;  %p547_p10 = scmp.lt.u32.totalorder %s543_s8, %s700_s7 }
 0x308   :  { %p549_p11 = pnand %p547_p10, %p544_p9 }
 0x30a   :  { %552 = shalt.err (!%p549_p11)
}
 0x30b   :  { %349 = dma.vmem_to_hbm [thread:$0]  %s347_s6, 128, %s700_s7, [#allocation4]  }
 0x30c   :  { %559 = dma.done.wait [#allocation4], 128  }
 0x30d   :  { %560 = vsyncadd [#allocation4], 4294967168 }
 0x30e   :  { %353 = vsyncpa [#allocation3], 1 }
 0x30f   :  { %354 = vsyncpa [#allocation6], 1 }
 0x310   :  { %355 = vsyncpa [#allocation9], 1 }
 0x311   :  { %356 = vsyncpa [#allocation4], 1 }

</bundles_post_ra>
